<compile_context>
chip_gen: v7x
topology: tpu7x:2x2x1
jax: 0.10.0
libtpu: 0.0.40
codegen_flags: <defaults>
</compile_context>

<pallas_src>
import functools

import jax
import jax.numpy as jnp
from jax.experimental import pallas as pl
from jax.experimental.pallas import tpu as pltpu

_CHUNK = 256                                  # rows processed per in-kernel sub-step
_DIMS = [(12, 50), (50, 30), (30, 10), (10, 4)]


def _round_up(x, m):
    return ((x + m - 1) // m) * m


def _cdiv(a, b):
    return (a + b - 1) // b


def _ensembler_kernel(x_ref,
                      w1_ref, b1_ref,
                      w2_ref, b2_ref,
                      w3_ref, b3_ref,
                      w4_ref, b4_ref,
                      o_ref, *, chunk):
    # Weights/biases use constant-index full-array BlockSpecs -> resident across the
    # grid; load once per grid step (tiny: they all fit in a handful of vregs).
    w1 = w1_ref[...]; b1 = b1_ref[...]
    w2 = w2_ref[...]; b2 = b2_ref[...]
    w3 = w3_ref[...]; b3 = b3_ref[...]
    w4 = w4_ref[...]; b4 = b4_ref[...]

    rows = x_ref.shape[0]
    r0 = 0
    # Static Python loop (rows and chunk are trace-time constants) -> static slices,
    # independent sub-chunks, intermediates never materialize at full-tile size.
    while r0 < rows:
        c = min(chunk, rows - r0)
        x = x_ref[pl.ds(r0, c), :]                       # bf16 [c, 12]

        h = jnp.dot(x, w1, preferred_element_type=jnp.float32) + b1
        h = jnp.maximum(h, 0.0).astype(jnp.bfloat16)

        h = jnp.dot(h, w2, preferred_element_type=jnp.float32) + b2
        h = jnp.maximum(h, 0.0).astype(jnp.bfloat16)

        h = jnp.dot(h, w3, preferred_element_type=jnp.float32) + b3
        h = jnp.maximum(h, 0.0).astype(jnp.bfloat16)

        h = jnp.dot(h, w4, preferred_element_type=jnp.float32) + b4

        o_ref[pl.ds(r0, c), :] = h.astype(o_ref.dtype)   # f32 [c, 4]
        r0 += c


def ensembler_forward(x, params, *, tb=8192):
    """x: [B, 12] float32; params: dict of (w, b) with w = [in, out], b = [1, out]."""
    B, F = x.shape
    assert F == 12, F

    # One-time casts: matmul operands in bf16 (single-pass MXU on all gens, halves
    # the x HBM read); biases stay f32 so the elementwise math stays f32.
    ws = [params[f"w{i}"].astype(jnp.bfloat16) for i in range(1, 5)]
    bs = [params[f"b{i}"].astype(jnp.float32) for i in range(1, 5)]
    x_bf = x.astype(jnp.bfloat16)

    # Batch tiling: tb_eff a multiple of 8; at least 2 grid steps for moderate/large
    # batches so v7x's two TensorCores both get work; tiles sized to minimize padding.
    target = _round_up(B, 8)
    tb_cap = _round_up(min(tb, target), 8)
    min_steps = 2 if B >= 1024 else 1
    steps = max(_cdiv(target, tb_cap), min_steps)
    tb_eff = _round_up(_cdiv(target, steps), 8)
    b_pad = _round_up(B, tb_eff)
    if b_pad != B:
        x_bf = jnp.pad(x_bf, ((0, b_pad - B), (0, 0)))   # zero rows, sliced off below
    grid = (b_pad // tb_eff,)

    def const_spec(arr):
        return pl.BlockSpec(arr.shape, lambda i: (0, 0))

    in_specs = [pl.BlockSpec((tb_eff, 12), lambda i: (i, 0))]   # x: batch-tiled
    operands = [x_bf]
    for wi, bi in zip(ws, bs):
        in_specs += [const_spec(wi), const_spec(bi)]
        operands += [wi, bi]

    # Advisory cost estimate with the true 10->4 last layer and bf16/f32 byte counts.
    flops = 2 * b_pad * sum(i * o for i, o in _DIMS)
    weight_bytes = sum(int(a.size) * a.dtype.itemsize for a in (ws + bs))
    bytes_accessed = b_pad * (12 * 2 + 4 * 4) + weight_bytes

    # VMEM budget: double-buffered x (bf16, lane-padded) + double-buffered out (f32,
    # lane-padded) + per-chunk intermediates + weights/headroom.  Clamp to <=64 MiB
    # so the limit is safe on v7x (64 MiB physical per TC).
    vmem_bytes = (2 * tb_eff * 128 * 2
                  + 2 * tb_eff * 128 * 4
                  + 6 * _CHUNK * 128 * 4
                  + (1 << 20))
    vmem_limit = int(min(max(2 * vmem_bytes, 32 << 20), 64 << 20))

    out = pl.pallas_call(
        functools.partial(_ensembler_kernel, chunk=_CHUNK),
        out_shape=jax.ShapeDtypeStruct((b_pad, 4), jnp.float32),
        grid=grid,
        in_specs=in_specs,
        out_specs=pl.BlockSpec((tb_eff, 4), lambda i: (i, 0)),
        compiler_params=pltpu.CompilerParams(
            dimension_semantics=("parallel",),
            vmem_limit_bytes=vmem_limit),
        cost_estimate=pl.CostEstimate(
            flops=flops, transcendentals=0, bytes_accessed=bytes_accessed),
    )(*operands)

    return out[:B, :]


def init_params(key):
    """Deterministic synthetic init matching nn.Linear shapes (stored transposed)."""
    params = {}
    for i, (fan_in, fan_out) in enumerate(_DIMS, start=1):
        key, kw, kb = jax.random.split(key, 3)
        bound = 1.0 / jnp.sqrt(fan_in)
        # PyTorch Linear weight is [out, in]; we store its transpose [in, out].
        params[f"w{i}"] = jax.random.uniform(
            kw, (fan_in, fan_out), jnp.float32, -bound, bound)
        # Bias kept 2D [1, out] for clean (sublane, lane) layout; broadcasts over batch.
        params[f"b{i}"] = jax.random.uniform(
            kb, (1, fan_out), jnp.float32, -bound, bound)
    return params


def _reference_forward(x, params):
    h = x
    for i in range(1, 5):
        h = h @ params[f"w{i}"] + params[f"b{i}"]
        if i < 4:
            h = jnp.maximum(h, 0.0)
    return h


if __name__ == "__main__":
    key = jax.random.PRNGKey(0)
    kx, kp = jax.random.split(key)
    params = init_params(kp)

    # Small batch.
    x = jax.random.normal(kx, (8, 12), jnp.float32)
    out = jax.block_until_ready(ensembler_forward(x, params))
    assert out.shape == (8, 4), out.shape
    assert jnp.allclose(out, _reference_forward(x, params), atol=5e-2, rtol=5e-2), \
        "mismatch vs JAX reference (small batch)"

    # Ragged batch + small tile -> exercises batch padding and a multi-step grid.
    x2 = jax.random.normal(kx, (37, 12), jnp.float32)
    out2 = jax.block_until_ready(ensembler_forward(x2, params, tb=16))
    assert out2.shape == (37, 4), out2.shape
    assert jnp.allclose(out2, _reference_forward(x2, params), atol=5e-2, rtol=5e-2), \
        "mismatch vs JAX reference (ragged batch)"

    # Batch > _CHUNK -> exercises the in-kernel chunk loop (256 + 256 + 88 rows).
    x3 = jax.random.normal(kx, (600, 12), jnp.float32)
    out3 = jax.block_until_ready(ensembler_forward(x3, params))
    assert out3.shape == (600, 4), out3.shape
    assert jnp.allclose(out3, _reference_forward(x3, params), atol=5e-2, rtol=5e-2), \
        "mismatch vs JAX reference (chunked batch)"

    print("KERNEL_OK")
</pallas_src>

<mosaic_0001>
module attributes {stable_mosaic.version = 11 : i64} {
  func.func @_ensembler_kernel(%arg0: i32, %arg1: memref<8x12xbf16, #tpu.memory_space<vmem>>, %arg2: memref<12x50xbf16, #tpu.memory_space<vmem>>, %arg3: memref<1x50xf32, #tpu.memory_space<vmem>>, %arg4: memref<50x30xbf16, #tpu.memory_space<vmem>>, %arg5: memref<1x30xf32, #tpu.memory_space<vmem>>, %arg6: memref<30x10xbf16, #tpu.memory_space<vmem>>, %arg7: memref<1x10xf32, #tpu.memory_space<vmem>>, %arg8: memref<10x4xbf16, #tpu.memory_space<vmem>>, %arg9: memref<1x4xf32, #tpu.memory_space<vmem>>, %arg10: memref<8x4xf32, #tpu.memory_space<vmem>>) attributes {dimension_semantics = [#tpu.dimension_semantics<parallel>], iteration_bounds = array<i64: 1>, scalar_prefetch = 0 : i64, scratch_operands = 0 : i64, tpu.core_type = #tpu.core_type<tc>, window_params = [{transform_indices = @transform_0, window_bounds = array<i64: 8, 12>}, {pipeline_mode = #tpu.pipeline_mode<synchronous>, transform_indices = @transform_1, window_bounds = array<i64: 12, 50>}, {pipeline_mode = #tpu.pipeline_mode<synchronous>, transform_indices = @transform_2, window_bounds = array<i64: 1, 50>}, {pipeline_mode = #tpu.pipeline_mode<synchronous>, transform_indices = @transform_3, window_bounds = array<i64: 50, 30>}, {pipeline_mode = #tpu.pipeline_mode<synchronous>, transform_indices = @transform_4, window_bounds = array<i64: 1, 30>}, {pipeline_mode = #tpu.pipeline_mode<synchronous>, transform_indices = @transform_5, window_bounds = array<i64: 30, 10>}, {pipeline_mode = #tpu.pipeline_mode<synchronous>, transform_indices = @transform_6, window_bounds = array<i64: 1, 10>}, {pipeline_mode = #tpu.pipeline_mode<synchronous>, transform_indices = @transform_7, window_bounds = array<i64: 10, 4>}, {pipeline_mode = #tpu.pipeline_mode<synchronous>, transform_indices = @transform_8, window_bounds = array<i64: 1, 4>}, {transform_indices = @transform_9, window_bounds = array<i64: 8, 4>}]} {
    %c0 = arith.constant 0 : index
    %c0_0 = arith.constant 0 : index
    %0 = vector.load %arg2[%c0, %c0_0] : memref<12x50xbf16, #tpu.memory_space<vmem>>, vector<12x50xbf16>
    %c0_1 = arith.constant 0 : index
    %c0_2 = arith.constant 0 : index
    %1 = vector.load %arg3[%c0_1, %c0_2] : memref<1x50xf32, #tpu.memory_space<vmem>>, vector<1x50xf32>
    %c0_3 = arith.constant 0 : index
    %c0_4 = arith.constant 0 : index
    %2 = vector.load %arg4[%c0_3, %c0_4] : memref<50x30xbf16, #tpu.memory_space<vmem>>, vector<50x30xbf16>
    %c0_5 = arith.constant 0 : index
    %c0_6 = arith.constant 0 : index
    %3 = vector.load %arg5[%c0_5, %c0_6] : memref<1x30xf32, #tpu.memory_space<vmem>>, vector<1x30xf32>
    %c0_7 = arith.constant 0 : index
    %c0_8 = arith.constant 0 : index
    %4 = vector.load %arg6[%c0_7, %c0_8] : memref<30x10xbf16, #tpu.memory_space<vmem>>, vector<30x10xbf16>
    %c0_9 = arith.constant 0 : index
    %c0_10 = arith.constant 0 : index
    %5 = vector.load %arg7[%c0_9, %c0_10] : memref<1x10xf32, #tpu.memory_space<vmem>>, vector<1x10xf32>
    %c0_11 = arith.constant 0 : index
    %c0_12 = arith.constant 0 : index
    %6 = vector.load %arg8[%c0_11, %c0_12] : memref<10x4xbf16, #tpu.memory_space<vmem>>, vector<10x4xbf16>
    %c0_13 = arith.constant 0 : index
    %c0_14 = arith.constant 0 : index
    %7 = vector.load %arg9[%c0_13, %c0_14] : memref<1x4xf32, #tpu.memory_space<vmem>>, vector<1x4xf32>
    %c0_15 = arith.constant 0 : index
    %c0_16 = arith.constant 0 : index
    %8 = vector.load %arg1[%c0_15, %c0_16] : memref<8x12xbf16, #tpu.memory_space<vmem>>, vector<8x12xbf16>
    %cst = arith.constant dense<0.000000e+00> : vector<8x50xf32>
    %9 = tpu.matmul %8, %0, %cst {dimension_numbers = #tpu.dot_dimension_numbers<[1], [0], [0], [1], [0, 0, 1, 1], [], []>} : vector<8x12xbf16>, vector<12x50xbf16>, vector<8x50xf32> -> vector<8x50xf32>
    %10 = vector.broadcast %1 : vector<1x50xf32> to vector<8x50xf32>
    %11 = arith.addf %9, %10 : vector<8x50xf32>
    %cst_17 = arith.constant 0.000000e+00 : f32
    %12 = vector.broadcast %cst_17 : f32 to vector<8x50xf32>
    %13 = arith.maximumf %11, %12 : vector<8x50xf32>
    %14 = arith.truncf %13 : vector<8x50xf32> to vector<8x50xbf16>
    %cst_18 = arith.constant dense<0.000000e+00> : vector<8x30xf32>
    %15 = tpu.matmul %14, %2, %cst_18 {dimension_numbers = #tpu.dot_dimension_numbers<[1], [0], [0], [1], [0, 0, 1, 1], [], []>} : vector<8x50xbf16>, vector<50x30xbf16>, vector<8x30xf32> -> vector<8x30xf32>
    %16 = vector.broadcast %3 : vector<1x30xf32> to vector<8x30xf32>
    %17 = arith.addf %15, %16 : vector<8x30xf32>
    %cst_19 = arith.constant 0.000000e+00 : f32
    %18 = vector.broadcast %cst_19 : f32 to vector<8x30xf32>
    %19 = arith.maximumf %17, %18 : vector<8x30xf32>
    %20 = arith.truncf %19 : vector<8x30xf32> to vector<8x30xbf16>
    %cst_20 = arith.constant dense<0.000000e+00> : vector<8x10xf32>
    %21 = tpu.matmul %20, %4, %cst_20 {dimension_numbers = #tpu.dot_dimension_numbers<[1], [0], [0], [1], [0, 0, 1, 1], [], []>} : vector<8x30xbf16>, vector<30x10xbf16>, vector<8x10xf32> -> vector<8x10xf32>
    %22 = vector.broadcast %5 : vector<1x10xf32> to vector<8x10xf32>
    %23 = arith.addf %21, %22 : vector<8x10xf32>
    %cst_21 = arith.constant 0.000000e+00 : f32
    %24 = vector.broadcast %cst_21 : f32 to vector<8x10xf32>
    %25 = arith.maximumf %23, %24 : vector<8x10xf32>
    %26 = arith.truncf %25 : vector<8x10xf32> to vector<8x10xbf16>
    %cst_22 = arith.constant dense<0.000000e+00> : vector<8x4xf32>
    %27 = tpu.matmul %26, %6, %cst_22 {dimension_numbers = #tpu.dot_dimension_numbers<[1], [0], [0], [1], [0, 0, 1, 1], [], []>} : vector<8x10xbf16>, vector<10x4xbf16>, vector<8x4xf32> -> vector<8x4xf32>
    %28 = vector.broadcast %7 : vector<1x4xf32> to vector<8x4xf32>
    %29 = arith.addf %27, %28 : vector<8x4xf32>
    %c0_23 = arith.constant 0 : index
    %c0_24 = arith.constant 0 : index
    %30 = vector.load %arg10[%c0_23, %c0_24] : memref<8x4xf32, #tpu.memory_space<vmem>>, vector<8x4xf32>
    tpu.vector_store %arg10[%c0_23, %c0_24], %29 {strides = array<i32>} : memref<8x4xf32, #tpu.memory_space<vmem>>, vector<8x4xf32>,
    return
  }
  func.func @transform_0(%arg0: i32) -> (i32, i32) {
    %c0_i32 = arith.constant 0 : i32
    %c0_i32_0 = arith.constant 0 : i32
    return %arg0, %c0_i32 : i32, i32
  }
  func.func @transform_1(%arg0: i32) -> (i32, i32) {
    %c0_i32 = arith.constant 0 : i32
    %c0_i32_0 = arith.constant 0 : i32
    %c0_i32_1 = arith.constant 0 : i32
    return %c0_i32, %c0_i32_0 : i32, i32
  }
  func.func @transform_2(%arg0: i32) -> (i32, i32) {
    %c0_i32 = arith.constant 0 : i32
    %c0_i32_0 = arith.constant 0 : i32
    %c0_i32_1 = arith.constant 0 : i32
    return %c0_i32, %c0_i32_0 : i32, i32
  }
  func.func @transform_3(%arg0: i32) -> (i32, i32) {
    %c0_i32 = arith.constant 0 : i32
    %c0_i32_0 = arith.constant 0 : i32
    %c0_i32_1 = arith.constant 0 : i32
    return %c0_i32, %c0_i32_0 : i32, i32
  }
  func.func @transform_4(%arg0: i32) -> (i32, i32) {
    %c0_i32 = arith.constant 0 : i32
    %c0_i32_0 = arith.constant 0 : i32
    %c0_i32_1 = arith.constant 0 : i32
    return %c0_i32, %c0_i32_0 : i32, i32
  }
  func.func @transform_5(%arg0: i32) -> (i32, i32) {
    %c0_i32 = arith.constant 0 : i32
    %c0_i32_0 = arith.constant 0 : i32
    %c0_i32_1 = arith.constant 0 : i32
    return %c0_i32, %c0_i32_0 : i32, i32
  }
  func.func @transform_6(%arg0: i32) -> (i32, i32) {
    %c0_i32 = arith.constant 0 : i32
    %c0_i32_0 = arith.constant 0 : i32
    %c0_i32_1 = arith.constant 0 : i32
    return %c0_i32, %c0_i32_0 : i32, i32
  }
  func.func @transform_7(%arg0: i32) -> (i32, i32) {
    %c0_i32 = arith.constant 0 : i32
    %c0_i32_0 = arith.constant 0 : i32
    %c0_i32_1 = arith.constant 0 : i32
    return %c0_i32, %c0_i32_0 : i32, i32
  }
  func.func @transform_8(%arg0: i32) -> (i32, i32) {
    %c0_i32 = arith.constant 0 : i32
    %c0_i32_0 = arith.constant 0 : i32
    %c0_i32_1 = arith.constant 0 : i32
    return %c0_i32, %c0_i32_0 : i32, i32
  }
  func.func @transform_9(%arg0: i32) -> (i32, i32) {
    %c0_i32 = arith.constant 0 : i32
    %c0_i32_0 = arith.constant 0 : i32
    return %arg0, %c0_i32 : i32, i32
  }
}

</mosaic_0001>

<bundles_post_ra>
// kernel: tpu_custom_call.1
= control target key start
LH: loop header
LB: loop body
LE: loop exit
PB: predicated region body
PF: predicated region fallthrough
CT: control target
= control target key end

     0   :  { %vm68_vm0 = vcmask 1045504   ;;  %v393_v0 = vmov 0.0   ;;  %vm394_vm1 = vmmov 0   ;;  %vm64_vm2 = vcmask 97280   ;;  %s503_s1 = inlined_call_operand.vmem [shape: bf16[12,50], index: 1, kind: input, shape index: {}]   ;;  %s504_s3 = inlined_call_operand.vmem [shape: bf16[50,30], index: 3, kind: input, shape index: {}]   ;;  %s505_s0 = inlined_call_operand.vmem [shape: bf16[8,12], index: 0, kind: input, shape index: {}]   ;;  %s506_s5 = inlined_call_operand.vmem [shape: bf16[30,10], index: 5, kind: input, shape index: {}]   ;;  %s507_s2 = inlined_call_operand.vmem [shape: f32[1,50], index: 2, kind: input, shape index: {}]   ;;  %s508_s7 = inlined_call_operand.vmem [shape: bf16[10,4], index: 7, kind: input, shape index: {}]   ;;  %s509_s4 = inlined_call_operand.vmem [shape: f32[1,30], index: 4, kind: input, shape index: {}]   ;;  %s510_s6 = inlined_call_operand.vmem [shape: f32[1,10], index: 6, kind: input, shape index: {}]   ;;  %s511_s8 = inlined_call_operand.vmem [shape: f32[1,4], index: 8, kind: input, shape index: {}]   ;;  %s512_s9 = inlined_call_operand.vmem [shape: f32[8,4], index: 9, kind: output, shape index: {}]  }
   0x1   :  { %351 = vmatprep.subr.bf16.mxu0 %v393_v0  ;;  %v385_v1 = vld [vmem:[%s503_s1] sm:$0x3f]   ;;  %353 = vmatprep.mubr.msk.bf16.mxu0 %vm394_vm1, %v393_v0  ;;  %v387_v5 = vld [vmem:[%s504_s3 + $0x8] sm:$0xff]   ;;  %v388_v6 = vld [vmem:[%s504_s3 + $0x10] sm:$0xff]   ;;  %vm145_vm3 = vcmask 1040384   ;;  %vm141_vm4 = vcmask 408576  }
   0x2   :  { %357 = vmatprep.subr.bf16.mxu1 %v393_v0  ;;  %365 = vmatprep.mubr.msk.bf16.mxu1 %vm394_vm1, %v393_v0  ;;  %v70_v2 = vsel %vm68_vm0, %v385_v1, 0  ;;  %v386_v3 = vld [vmem:[%s504_s3] sm:$0xff]   ;;  %v389_v7 = vld [vmem:[%s504_s3 + $0x18] ss:$0 sps:$4 sm:$0x11]   ;;  %vm212_vm5 = vcmask 1046528  }
   0x3   :  { %352 = vmatpush3.bf16.msra.mxu0 %v70_v2  ;;  %v52_v4 = vld [vmem:[%s505_s0] sm:$0xf]  ;;  %358 = vmatpush3.bf16.msra.mxu1 %v386_v3  ;;  %v147_v8 = vsel %vm145_vm3, %v389_v7, 0  ;;  %v391_v18 = vld [vmem:[%s506_s5 + $0x8] sm:$0x7f]   ;;  %vm273_vm6 = vcmask 1044480  }
   0x4   :  { %369 = vmatprep.subr.bf16.mxu0 %v393_v0  ;;  %359 = vmatprep.subr.bf16.mxu1 %v393_v0  ;;  %v390_v9 = vld [vmem:[%s506_s5] sm:$0xff]   ;;  %v214_v19 = vsel %vm212_vm5, %v391_v18, 0  ;;  %vm208_vm7 = vcmask 244736   ;;  %vm269_vm8 = vcmask 80896   ;;  %vm317_vm9 = vcmask 31744  }
   0x5   :  { %v323_v10 = vld [vmem:[%s507_s2] ss:$0 sm:$0xff] }
   0x6   :  { %354 = vmatmul.mubr.msk.bf16.vlgmr.msra.gmra.mrb[0].mxu0 %vm64_vm2, %v52_v4  ;;  %v326_v20 = vld [vmem:[%s509_s4] ss:$0 sm:$0xff] }
   0x7   :  { %373 = vmatprep.mubr.msk.bf16.mxu0 %vm394_vm1, %v393_v0  ;;  %360 = vmatpush3.bf16.msra.mxu1 %v387_v5  ;;  %v392_v24 = vld [vmem:[%s508_s7] sm:$0x1f]  }
   0x8   :  { %361 = vmatprep.subr.bf16.mxu1 %v393_v0  ;;  %370 = vmatpush3.bf16.msra.mxu0 %v390_v9  ;;  %v275_v29 = vsel %vm273_vm6, %v392_v24, 0  ;;  %v332_v30 = vld [vmem:[%s510_s6] ss:$0 sm:$0xff] }
   0x9   :  { %371 = vmatprep.subr.bf16.mxu0 %v393_v0  ;;  %v336_v38 = vld [vmem:[%s511_s8] ss:$0 sm:$0xff] }
   0xb   :  { %362 = vmatpush3.bf16.msra.mxu1 %v388_v6 }
   0xc   :  { %363 = vmatprep.subr.bf16.mxu1 %v393_v0  ;;  %372 = vmatpush3.bf16.msra.mxu0 %v214_v19 }
   0xd   :  { %377 = vmatprep.subr.bf16.mxu0 %v393_v0 }
   0xf   :  { %364 = vmatpush3.bf16.msra.mxu1 %v147_v8 }
  0xd9   :  { %v106_v11 = vpop.f32.mrb[0].mxu0 }
  0xda   :  { %v107_v12 = vadd.f32 %v323_v10, %v106_v11  ;;  %v355_v13 = vpop.f32.mrb[1].mxu0 }
  0xdb   :  { %v109_v14 = vpop.f32.mrb[2].mxu0 }
  0xdc   :  { %v112_v15 = vmax.f32 %v107_v12, 0.0  ;;  %v356_v16 = vpop.f32.mrb[3].mxu0 }
  0xde   :  { %v113_v17 = vpack.c.bf16 %v112_v15, %v112_v15 }
  0xe0   :  { %366 = vmatmul.mubr.msk.bf16.vlgmr.msra.gmra.mrb[0].mxu1 %vm141_vm4, %v113_v17 }
 0x1b3   :  { %v183_v21 = vpop.f32.mrb[0].mxu1 }
 0x1b4   :  { %v184_v22 = vadd.f32 %v326_v20, %v183_v21  ;;  %v367_v23 = vpop.f32.mrb[1].mxu1 }
 0x1b5   :  { %v186_v25 = vpop.f32.mrb[2].mxu1 }
 0x1b6   :  { %v189_v26 = vmax.f32 %v184_v22, 0.0  ;;  %v368_v27 = vpop.f32.mrb[3].mxu1 }
 0x1b8   :  { %v190_v28 = vpack.c.bf16 %v189_v26, %v189_v26 }
 0x1ba   :  { %374 = vmatmul.mubr.msk.bf16.vlgmr.msra.gmra.mrb[4].mxu0 %vm208_vm7, %v190_v28 }
 0x1bb   :  { %378 = vmatpush3.bf16.msra.mxu0 %v275_v29  ;;  %379 = vmatprep.mubr.msk.bf16.mxu0 %vm394_vm1, %v393_v0 }
 0x28d   :  { %v250_v31 = vpop.f32.mrb[4].mxu0 }
 0x28e   :  { %v251_v32 = vadd.f32 %v332_v30, %v250_v31  ;;  %v375_v33 = vpop.f32.mrb[5].mxu0 }
 0x28f   :  { %v253_v34 = vpop.f32.mrb[6].mxu0 }
 0x290   :  { %v256_v35 = vmax.f32 %v251_v32, 0.0  ;;  %v376_v36 = vpop.f32.mrb[7].mxu0 }
 0x292   :  { %v257_v37 = vpack.c.bf16 %v256_v35, %v256_v35 }
 0x294   :  { %380 = vmatmul.mubr.msk.bf16.vlgmr.msra.gmra.mrb[8].mxu0 %vm269_vm8, %v257_v37 }
 0x367   :  { %v311_v39 = vpop.f32.mrb[8].mxu0 }
 0x368   :  { %v312_v40 = vadd.f32 %v336_v38, %v311_v39  ;;  %v381_v41 = vpop.f32.mrb[9].mxu0 }
 0x369   :  { %v314_v42 = vpop.f32.mrb[10].mxu0 }
 0x36a   :  { %318 = vst.msk [vmem:[%s512_s9] sm:$0xff] %vm317_vm9, %v312_v40  ;;  %v382_v43 = vpop.f32.mrb[11].mxu0 }

</bundles_post_ra>
